<compile_context>
chip_gen: v6e
topology: v6e:2x2x1
jax: 0.10.0
libtpu: 0.0.40
codegen_flags: <defaults>
</compile_context>

<pallas_src>
import functools

import jax
import jax.numpy as jnp
from jax.experimental import pallas as pl
from jax.experimental.pallas import tpu as pltpu

PEAK_FACTOR = 5.0   # peak_factor from __init__ (clamp branch is dead wrt the output)
TB = 8              # batch tile (sublane-aligned)
LANE = 128          # lane width; coding dim padded to a multiple of this


def illum_peak_kernel(illum_ref, pc_ref, z_ref, cmat_ref, out_ref):
    """One batch tile: scale illumination, add Gaussian shot-like noise, code.

    illum_ref : (1, N)   f32   IRF-filtered illumination (batch independent)
    pc_ref    : (TB, 1)  f32   photon counts for this batch tile
    z_ref     : (TB, N)  f32   standard-normal draws
    cmat_ref  : (N, Kp)  bf16  zero-padded coding matrix (lane-dense Kp)
    out_ref   : (TB, Kp) f32   coded output (padded)
    """
    illum = illum_ref[...]                                      # (1, N)

    # area = sum(illum); reciprocal routed to the EUP slot (otherwise idle).
    area = jnp.sum(illum, axis=1, keepdims=True)                # (1, 1)
    area = jnp.maximum(area, 1e-8)                              # guard: reference would inf
    inv_area = pl.reciprocal(area, approx=True)                 # (1, 1)

    scaling = pc_ref[...] * inv_area                            # (TB, 1)
    scaled = jnp.maximum(illum * scaling, 0.0)                  # (TB, N), sqrt guard

    # noise = Normal(0, sqrt(scaled)) realized from supplied standard normals.
    noisy = scaled + z_ref[...] * jnp.sqrt(scaled)              # (TB, N) f32

    # coding_model(noisy, None, False): linear coding matmul on the MXU,
    # bf16 operands / f32 accumulation, full-width (lane-dense) store.
    out_ref[...] = jnp.dot(noisy.astype(jnp.bfloat16), cmat_ref[...],
                           preferred_element_type=jnp.float32)  # (TB, Kp)


@jax.jit
def illumination_peak_forward(bins, photon_counts, sbrs, learnable, circ, cmat, z):
    B = photon_counts.shape[0]
    N = circ.shape[0]
    K = cmat.shape[1]

    # Dead-code inputs of the reference forward: `bins`/shifts only feed
    # `shifted_tensors`, `sbrs` only feeds the clamp/offset branch; neither
    # reaches the returned value, so they never enter the kernel (no DMA).
    _ = (bins, sbrs)

    # Batch-independent prologue hoisted to plain XLA: IRF1DLayer(relu(x)) as an
    # exact circular convolution (circulant matmul). Keeping this out of the
    # kernel removes its N*N operand from kernel DMA/VMEM entirely.
    illum = jnp.dot(jnp.maximum(learnable.astype(jnp.float32), 0.0),
                    circ.astype(jnp.float32))                   # (1, N) f32

    # Kernel-facing layouts.
    Kp = ((K + LANE - 1) // LANE) * LANE                        # lane-dense coding dim
    cmat_p = jnp.zeros((N, Kp), jnp.bfloat16).at[:, :K].set(cmat.astype(jnp.bfloat16))

    Bp = ((B + TB - 1) // TB) * TB                              # pad batch to tile
    # pc stays a single (TB,1) VMEM tile per grid step: one padded (8,128) tile
    # of DMA, negligible vs. an SMEM scalar-loop rebuild of the column vector.
    pc = jnp.ones((Bp, 1), jnp.float32).at[:B, 0].set(photon_counts.astype(jnp.float32))
    zp = jnp.zeros((Bp, N), jnp.float32).at[:B].set(z.astype(jnp.float32))

    grid = (Bp // TB,)
    cost = pl.CostEstimate(
        flops=2 * Bp * N * Kp + 6 * Bp * N,
        transcendentals=Bp * N + 1,
        bytes_accessed=4 * N + 4 * Bp + 4 * Bp * N + 2 * N * Kp + 4 * Bp * Kp,
    )

    out_p = pl.pallas_call(
        illum_peak_kernel,
        out_shape=jax.ShapeDtypeStruct((Bp, Kp), jnp.float32),
        grid=grid,
        in_specs=[
            pl.BlockSpec((1, N), lambda i: (0, 0)),     # illum (VMEM resident)
            pl.BlockSpec((TB, 1), lambda i: (i, 0)),    # photon counts, per batch tile
            pl.BlockSpec((TB, N), lambda i: (i, 0)),    # standard-normal draws
            pl.BlockSpec((N, Kp), lambda i: (0, 0)),    # bf16 coding matrix (resident)
        ],
        out_specs=pl.BlockSpec((TB, Kp), lambda i: (i, 0)),
        compiler_params=pltpu.CompilerParams(
            dimension_semantics=("parallel",),
        ),
        cost_estimate=cost,
    )(illum, pc, zp, cmat_p)

    # Drop batch padding and the zero coding columns.
    return out_p[:B, :K]


def build_params(n_tbins, n_codes, sigma):
    """Deterministic parameter construction matching __init__ shapes."""
    # learnable_input: (n_tbins, 1) filled with 1.0 -> stored lane-dense as (1, N).
    learnable = jnp.ones((1, n_tbins), jnp.float32)

    # Circularly wrapped Gaussian IRF, mu = (n_tbins - 1) // 2, width = sigma.
    t = jnp.arange(n_tbins)
    mu = (n_tbins - 1) // 2
    d = jnp.minimum(jnp.abs(t - mu), n_tbins - jnp.abs(t - mu)).astype(jnp.float32)
    irf = jnp.exp(-0.5 * (d / sigma) ** 2)
    irf = irf / jnp.sum(irf)

    # Circulant matrix so that y = x @ circ is the circular convolution with irf
    # (applied in XLA outside the kernel).
    idx = (t[None, :] - t[:, None]) % n_tbins
    circ = irf[idx].astype(jnp.float32)                               # (N, N)

    # Deterministic Fourier coding matrix for the synthetic coding_model.
    m = jnp.arange(n_codes // 2) + 1
    phase = 2.0 * jnp.pi * t[:, None].astype(jnp.float32) * m[None, :] / n_tbins
    cmat = jnp.concatenate([jnp.cos(phase), jnp.sin(phase)], axis=1)  # (N, K)
    return learnable, circ, cmat.astype(jnp.float32)


if __name__ == "__main__":
    B, N, K, SIGMA = 8, 256, 32, 10.0

    learnable, circ, cmat = build_params(N, K, SIGMA)

    key = jax.random.PRNGKey(0)
    kb, kp, ks, kz = jax.random.split(key, 4)
    bins = jax.random.randint(kb, (B,), 0, N)
    photon_counts = jax.random.uniform(kp, (B,), minval=100.0, maxval=1000.0)
    sbrs = jax.random.uniform(ks, (B,), minval=0.5, maxval=5.0)
    z = jax.random.normal(kz, (B, N), jnp.float32)   # standard-normal noise draws

    out = illumination_peak_forward(bins, photon_counts, sbrs,
                                    learnable, circ, cmat, z)
    jax.block_until_ready(out)
    assert out.shape == (B, K) and out.dtype == jnp.float32
    assert bool(jnp.all(jnp.isfinite(out)))
    print("KERNEL_OK")
</pallas_src>

<mosaic_0001>
module attributes {stable_mosaic.version = 11 : i64} {
  func.func @illum_peak_kernel(%arg0: i32, %arg1: memref<1x256xf32, #tpu.memory_space<vmem>>, %arg2: memref<8x1xf32, #tpu.memory_space<vmem>>, %arg3: memref<8x256xf32, #tpu.memory_space<vmem>>, %arg4: memref<256x128xbf16, #tpu.memory_space<vmem>>, %arg5: memref<8x128xf32, #tpu.memory_space<vmem>>) attributes {dimension_semantics = [#tpu.dimension_semantics<parallel>], iteration_bounds = array<i64: 1>, scalar_prefetch = 0 : i64, scratch_operands = 0 : i64, tpu.core_type = #tpu.core_type<tc>, window_params = [{pipeline_mode = #tpu.pipeline_mode<synchronous>, transform_indices = @transform_0, window_bounds = array<i64: 1, 256>}, {transform_indices = @transform_1, window_bounds = array<i64: 8, 1>}, {transform_indices = @transform_2, window_bounds = array<i64: 8, 256>}, {pipeline_mode = #tpu.pipeline_mode<synchronous>, transform_indices = @transform_3, window_bounds = array<i64: 256, 128>}, {transform_indices = @transform_4, window_bounds = array<i64: 8, 128>}]} {
    %c0 = arith.constant 0 : index
    %c0_0 = arith.constant 0 : index
    %0 = vector.load %arg1[%c0, %c0_0] : memref<1x256xf32, #tpu.memory_space<vmem>>, vector<1x256xf32>
    %cst = arith.constant dense<0.000000e+00> : vector<1xf32>
    %1 = vector.multi_reduction <add>, %0, %cst [1] : vector<1x256xf32> to vector<1xf32>
    %2 = vector.shape_cast %1 : vector<1xf32> to vector<1x1xf32>
    %cst_1 = arith.constant 9.99999993E-9 : f32
    %3 = vector.broadcast %cst_1 : f32 to vector<1x1xf32>
    %4 = arith.maximumf %2, %3 : vector<1x1xf32>
    %5 = tpu.reciprocal %4 {approx = true} : vector<1x1xf32> -> vector<1x1xf32>
    %c0_2 = arith.constant 0 : index
    %c0_3 = arith.constant 0 : index
    %6 = vector.load %arg2[%c0_2, %c0_3] : memref<8x1xf32, #tpu.memory_space<vmem>>, vector<8x1xf32>
    %7 = vector.broadcast %5 : vector<1x1xf32> to vector<8x1xf32>
    %8 = arith.mulf %6, %7 : vector<8x1xf32>
    %9 = vector.broadcast %0 : vector<1x256xf32> to vector<8x256xf32>
    %10 = vector.broadcast %8 : vector<8x1xf32> to vector<8x256xf32>
    %11 = arith.mulf %9, %10 : vector<8x256xf32>
    %cst_4 = arith.constant 0.000000e+00 : f32
    %12 = vector.broadcast %cst_4 : f32 to vector<8x256xf32>
    %13 = arith.maximumf %11, %12 : vector<8x256xf32>
    %c0_5 = arith.constant 0 : index
    %c0_6 = arith.constant 0 : index
    %14 = vector.load %arg3[%c0_5, %c0_6] : memref<8x256xf32, #tpu.memory_space<vmem>>, vector<8x256xf32>
    %15 = math.sqrt %13 : vector<8x256xf32>
    %16 = arith.mulf %14, %15 : vector<8x256xf32>
    %17 = arith.addf %13, %16 : vector<8x256xf32>
    %18 = arith.truncf %17 : vector<8x256xf32> to vector<8x256xbf16>
    %c0_7 = arith.constant 0 : index
    %c0_8 = arith.constant 0 : index
    %19 = vector.load %arg4[%c0_7, %c0_8] : memref<256x128xbf16, #tpu.memory_space<vmem>>, vector<256x128xbf16>
    %cst_9 = arith.constant dense<0.000000e+00> : vector<8x128xf32>
    %20 = tpu.matmul %18, %19, %cst_9 {dimension_numbers = #tpu.dot_dimension_numbers<[1], [0], [0], [1], [0, 0, 1, 1], [], []>} : vector<8x256xbf16>, vector<256x128xbf16>, vector<8x128xf32> -> vector<8x128xf32>
    %c0_10 = arith.constant 0 : index
    %c0_11 = arith.constant 0 : index
    %21 = vector.load %arg5[%c0_10, %c0_11] : memref<8x128xf32, #tpu.memory_space<vmem>>, vector<8x128xf32>
    tpu.vector_store %arg5[%c0_10, %c0_11], %20 {strides = array<i32>} : memref<8x128xf32, #tpu.memory_space<vmem>>, vector<8x128xf32>,
    return
  }
  func.func @transform_0(%arg0: i32) -> (i32, i32) {
    %c0_i32 = arith.constant 0 : i32
    %c0_i32_0 = arith.constant 0 : i32
    %c0_i32_1 = arith.constant 0 : i32
    return %c0_i32, %c0_i32_0 : i32, i32
  }
  func.func @transform_1(%arg0: i32) -> (i32, i32) {
    %c0_i32 = arith.constant 0 : i32
    %c0_i32_0 = arith.constant 0 : i32
    return %arg0, %c0_i32 : i32, i32
  }
  func.func @transform_2(%arg0: i32) -> (i32, i32) {
    %c0_i32 = arith.constant 0 : i32
    %c0_i32_0 = arith.constant 0 : i32
    return %arg0, %c0_i32 : i32, i32
  }
  func.func @transform_3(%arg0: i32) -> (i32, i32) {
    %c0_i32 = arith.constant 0 : i32
    %c0_i32_0 = arith.constant 0 : i32
    %c0_i32_1 = arith.constant 0 : i32
    return %c0_i32, %c0_i32_0 : i32, i32
  }
  func.func @transform_4(%arg0: i32) -> (i32, i32) {
    %c0_i32 = arith.constant 0 : i32
    %c0_i32_0 = arith.constant 0 : i32
    return %arg0, %c0_i32 : i32, i32
  }
}

</mosaic_0001>

<bundles_post_ra>
// kernel: illumination_peak_forward.1
= control target key start
LH: loop header
LB: loop body
LE: loop exit
PB: predicated region body
PF: predicated region fallthrough
CT: control target
= control target key end

     0   :  { %v21_v0 = vlaneseq  ;;  %vm31_vm0 = vcmask 1040384   ;;  %s434_s0 = inlined_call_operand.vmem [shape: f32[1,256], index: 0, kind: input, shape index: {}]   ;;  %s435_s1 = inlined_call_operand.vmem [shape: f32[8,1], index: 1, kind: input, shape index: {}]   ;;  %s436_s2 = inlined_call_operand.vmem [shape: f32[8,256], index: 2, kind: input, shape index: {}]   ;;  %s437_s3 = inlined_call_operand.vmem [shape: bf16[256,128], index: 3, kind: input, shape index: {}]   ;;  %s438_s4 = inlined_call_operand.hbm [shape: f32[8,128], index: 4, kind: output, shape index: {}]  }
   0x1   :  { %v19_v1 = vld [vmem:[%s434_s0] sm:$0x3] }
   0x2   :  { %v22_v2 = vshrl.u32 %v21_v0, 7 }
   0x4   :  { %v23_v3 = vsub.s32 0, %v22_v2  ;;  %v27_v4 = vsub.s32 1, %v22_v2 }
   0x6   :  { %v24_v5 = vrot.slane %v19_v1, %v23_v3  ;;  %v28_v6 = vrot.slane %v19_v1, %v27_v4 }
   0x8   :  { %v32_v7 = vsel %vm31_vm0, %v24_v5, 0.0  ;;  %v33_v8 = vsel %vm31_vm0, %v28_v6, 0.0 }
   0x9   :  { %v34_v9 = vadd.f32 %v33_v8, %v32_v7 }
   0xb   :  { %35 = vadd.xlane.f32.xlu0 %v34_v9 }
   0xc   :  { %9 = vsyncpa [#allocation3], 0  ;;  %v344_v10 = vmov 0   ;;  %v300_v11 = vld [vmem:[%s437_s3 + $0x78] sm:$0xff]   ;;  %v39_v16 = vld [vmem:[%s435_s1] sm:$0xff]  ;;  %s345_s25 = smov [#allocation2]  }
   0xd   :  { %299 = vset.pattern.permute.xlu0 %v344_v10  ;;  %v301_v12 = vld [vmem:[%s437_s3 + $0x38] sm:$0xff]   ;;  %275 = vmatprep.subr.bf16.mxu0 %v300_v11  ;;  %v302_v17 = vld [vmem:[%s437_s3 + $0x70] sm:$0xff]   ;;  %v304_v21 = vld [vmem:[%s437_s3 + $0x68] sm:$0xff]   ;;  %s251_s26 = sshll.u32 %s345_s25, 4  ;;  %s252_s26 = int_to_ptr.vmem [resolvable:$true] %s251_s26 }
   0xe   :  { %276 = vmatpush3.bf16.msra.mxu0 %v301_v12  ;;  %v303_v19 = vld [vmem:[%s437_s3 + $0x30] sm:$0xff]   ;;  %v305_v22 = vld [vmem:[%s437_s3 + $0x28] sm:$0xff]   ;;  %v306_v23 = vld [vmem:[%s437_s3 + $0x60] sm:$0xff]   ;;  %p327_p1 = scmp.lt.s32.totalorder %s252_s26, %s252_s26 }
   0xf   :  { %277 = vmatprep.subr.bf16.mxu0 %v302_v17  ;;  %v307_v24 = vld [vmem:[%s437_s3 + $0x20] sm:$0xff]   ;;  %v308_v25 = vld [vmem:[%s437_s3 + $0x58] sm:$0xff]   ;;  %v310_v27 = vld [vmem:[%s437_s3 + $0x50] sm:$0xff]  }
  0x10   :  { %v309_v26 = vld [vmem:[%s437_s3 + $0x18] sm:$0xff]   ;;  %v311_v28 = vld [vmem:[%s437_s3 + $0x10] sm:$0xff]   ;;  %v312_v29 = vld [vmem:[%s437_s3 + $0x48] sm:$0xff]  }
  0x11   :  { %v313_v30 = vld [vmem:[%s437_s3 + $0x8] sm:$0xff]   ;;  %v314_v31 = vld [vmem:[%s437_s3 + $0x40] sm:$0xff]  }
  0x12   :  { %278 = vmatpush3.bf16.msra.mxu0 %v303_v19  ;;  %v315_v32 = vld [vmem:[%s437_s3] sm:$0xff]   ;;  %v55_v44 = vld [vmem:[%s436_s2 + $0x8] sm:$0xff] }
  0x13   :  { %279 = vmatprep.subr.bf16.mxu0 %v304_v21  ;;  %v54_v42 = vld [vmem:[%s436_s2] sm:$0xff]  ;;  %s322_s2 = scalar_lea.vmem %s252_s26, 128 }
  0x14   :  { %p323_p0 = scmp.ne.s32.totalorder %s252_s26, %s322_s2  ;;  %p328_p2 = scmp.lt.s32.totalorder %s322_s2, %s322_s2 }
  0x16   :  { %280 = vmatpush3.bf16.msra.mxu0 %v305_v22  ;;  %p329_p3 = por %p328_p2, %p327_p1 }
  0x17   :  { %281 = vmatprep.subr.bf16.mxu0 %v306_v23 }
  0x18   :  { %p330_p4 = pnand %p329_p3, %p323_p0 }
  0x1a   :  { %282 = vmatpush3.bf16.msra.mxu0 %v307_v24 }
  0x1b   :  { %283 = vmatprep.subr.bf16.mxu0 %v308_v25 }
  0x1e   :  { %284 = vmatpush3.bf16.msra.mxu0 %v309_v26 }
  0x1f   :  { %285 = vmatprep.subr.bf16.mxu0 %v310_v27 }
  0x22   :  { %286 = vmatpush3.bf16.msra.mxu0 %v311_v28 }
  0x23   :  { %287 = vmatprep.subr.bf16.mxu0 %v312_v29 }
  0x26   :  { %288 = vmatpush3.bf16.msra.mxu0 %v313_v30 }
  0x27   :  { %289 = vmatprep.subr.bf16.mxu0 %v314_v31 }
  0x2a   :  { %290 = vmatpush3.bf16.msra.mxu0 %v315_v32 }
  0x94   :  { %v36_v13 = vpop.xlane.xlu0 %35 }
  0x95   :  { %v37_v14 = vmax.f32 %v36_v13, 1e-08 }
  0x97   :  { %316 = vrcp.f32 %v37_v14 }
  0xa4   :  { %v317_v15 = vpop.eup %316 }
  0xa5   :  { %v43_v18 = vrot.slane %v317_v15, %v23_v3 }
  0xa7   :  { %v44_v20 = vmul.f32 %v43_v18, %v39_v16 }
  0xa9   :  { %47 = vperm.xlu0 %299, %v44_v20  }
 0x124   :  { %v48_v33 = vpop.permute.xlu0 %47 }
 0x125   :  { %v50_v34 = vmul.f32 %v48_v33, %v24_v5  ;;  %v51_v35 = vmul.f32 %v48_v33, %v28_v6 }
 0x127   :  { %v52_v36 = vmax.f32 %v50_v34, 0.0  ;;  %v53_v37 = vmax.f32 %v51_v35, 0.0 }
 0x129   :  { %318 = vrsqrt.f32 %v52_v36  ;;  %vm58_vm1 = vcmp.eq.f32.partialorder %v52_v36, inf  ;;  %v61_v43 = vand.u32 2147483648, %v52_v36  ;;  %vm65_vm2 = vcmp.eq.f32.partialorder %v53_v37, inf }
 0x12a   :  { %320 = vrsqrt.f32 %v53_v37  ;;  %v68_v45 = vand.u32 2147483648, %v53_v37  ;;  %vm60_vm3 = vcmp.eq.f32.partialorder %v52_v36, 0.0  ;;  %vm67_vm4 = vcmp.eq.f32.partialorder %v53_v37, 0.0 }
 0x136   :  { %v319_v38 = vpop.eup %318 }
 0x137   :  { %v321_v39 = vpop.eup %320  ;;  %v57_v40 = vmul.f32 %v319_v38, %v52_v36 }
 0x138   :  { %v64_v41 = vmul.f32 %v321_v39, %v53_v37 }
 0x139   :  { %v59_v46 = vsel %vm58_vm1, %v52_v36, %v57_v40 }
 0x13a   :  { %v66_v47 = vsel %vm65_vm2, %v53_v37, %v64_v41  ;;  %v62_v48 = vsel %vm60_vm3, %v61_v43, %v59_v46 }
 0x13b   :  { %v69_v49 = vsel %vm67_vm4, %v68_v45, %v66_v47  ;;  %v70_v50 = vmul.f32 %v62_v48, %v54_v42 }
 0x13c   :  { %v71_v51 = vmul.f32 %v69_v49, %v55_v44 }
 0x13d   :  { %v72_v52 = vadd.f32 %v70_v50, %v52_v36 }
 0x13e   :  { %v73_v53 = vadd.f32 %v71_v51, %v53_v37 }
 0x13f   :  { %v74_v54 = vpack.c.bf16 %v72_v52, %v72_v52 }
 0x140   :  { %v75_v55 = vpack.c.bf16 %v73_v53, %v73_v53 }
 0x142   :  { %236 = vmatprep.mubr.bf16.mxu0 %v75_v55 }
 0x143   :  { %237 = vmatmul.mubr.bf16.vlgmr.msra.gmra.mxu0 %v74_v54 }
 0x203   :  { %v291_v56 = vpop.f32.mrf.mxu0 }
 0x205   :  { %v292_v57 = vpop.f32.mrf.mxu0 }
 0x206   :  { %v293_v58 = vadd.f32 %v292_v57, %v291_v56 }
 0x207   :  { %v294_v59 = vpop.f32.mrf.mxu0 }
 0x208   :  { %244 = vst [vmem:[#allocation2] sm:$0xff] %v293_v58 }
 0x209   :  { %v295_v60 = vpop.f32.mrf.mxu0 }
 0x20a   :  { %333 = shalt.err (!%p330_p4)
}
 0x20b   :  { %254 = dma.vmem_to_hbm [thread:$0]  %s252_s26, 128, %s438_s4, [#allocation3]  }
 0x20c   :  { %342 = dma.done.wait [#allocation3], 128  }
 0x20d   :  { %343 = vsyncadd [#allocation3], 4294967168 }
 0x20e   :  { %258 = vsyncpa [#allocation3], 1 }

</bundles_post_ra>
